<compile_context>
chip_gen: v6e
topology: v6e:2x2x1
jax: 0.10.0
libtpu: 0.0.40
codegen_flags: <defaults>
</compile_context>

<pallas_src>
import jax
import jax.numpy as jnp
from jax import lax
from jax.experimental import pallas as pl
from jax.experimental.pallas import tpu as pltpu

HIDDEN = 32
INTERMEDIATE = 4 * HIDDEN
VOCAB = 64
BATCH = 2
SEQ = 8
LANES = 128  # lane-dense width of the reward-score output slab

_VMEM_SPEC = pl.BlockSpec(memory_space=pltpu.MemorySpace.VMEM)


# ------------------------------ fused kernel ------------------------------- #

def _reward_fwd_kernel(ids_ref, tgt_ref, embed_ref, g_ref, b_ref,
                       w1_ref, w2_ref, vh_ref, o_ref):
    """Fused embed -> pre-LN MLP block -> last-token reward head.

    ids_ref:   (B*S, 1)   int32  flattened token ids (column)
    tgt_ref:   (128, 1)   int32  flat last-token index per batch row, -1 pad
    embed_ref: (V, H)     bf16   embedding table
    g_ref:     (1, H)     f32    LayerNorm gamma
    b_ref:     (1, H)     f32    LayerNorm beta
    w1_ref:    (H, I)     bf16   MLP up-projection
    w2_ref:    (I, H)     bf16   MLP down-projection
    vh_ref:    (1, H)     bf16   v_head weight (nn.Linear(H, 1, bias=False))
    o_ref:     (1, 128)   f32    lane-dense reward scores (cols >= B are 0)
    """
    BS = ids_ref.shape[0]
    BP = tgt_ref.shape[0]          # 128 lane-padded batch rows
    V = embed_ref.shape[0]
    bf16 = jnp.bfloat16

    # -- embedding gather as one-hot MXU matmul (exact: table stored in bf16) --
    ids = ids_ref[...]                                              # (BS, 1) i32
    onehot = jnp.where(
        lax.broadcasted_iota(jnp.int32, (BS, V), 1) == ids, 1.0, 0.0
    ).astype(bf16)                                                  # (BS, V)
    x = jnp.dot(onehot, embed_ref[...],
                preferred_element_type=jnp.float32)                 # (BS, H) f32

    # -- stand-in BaseModel block: pre-LN MLP with residual (f32 LN / gelu) --
    mu = jnp.mean(x, axis=-1, keepdims=True)
    var = jnp.mean((x - mu) ** 2, axis=-1, keepdims=True)
    xn = (x - mu) * lax.rsqrt(var + 1e-5)
    xn = xn * g_ref[...] + b_ref[...]
    h1 = jax.nn.gelu(jnp.dot(xn.astype(bf16), w1_ref[...],
                             preferred_element_type=jnp.float32))   # (BS, I)
    h = x + jnp.dot(h1.astype(bf16), w2_ref[...],
                    preferred_element_type=jnp.float32)             # (BS, H)

    # -- reward head: padded one-hot last-token select + v_head projection --
    # sel[b, t] = 1 iff t == tgt[b]; padded rows (tgt == -1) select nothing.
    sel = jnp.where(
        lax.broadcasted_iota(jnp.int32, (BP, BS), 1) == tgt_ref[...], 1.0, 0.0
    ).astype(bf16)                                                  # (BP, BS)
    last = jnp.dot(sel, h.astype(bf16),
                   preferred_element_type=jnp.float32)              # (BP, H)
    # (1, H) x (BP, H) contracting H -> lane-dense (1, 128) score slab.
    o_ref[...] = lax.dot_general(
        vh_ref[...], last.astype(bf16),
        dimension_numbers=(((1,), (1,)), ((), ())),
        preferred_element_type=jnp.float32)


# ------------------------------- parameters -------------------------------- #

def init_params(key):
    ks = jax.random.split(key, 4)
    # Matmul weights stored bf16: halves DMA/VMEM bytes; the one-hot embedding
    # "gather" stays exact because the table values are bf16 by construction.
    embed = (jax.random.normal(ks[0], (VOCAB, HIDDEN), jnp.float32) * 0.02
             ).astype(jnp.bfloat16)
    gamma = jnp.ones((1, HIDDEN), jnp.float32)
    beta = jnp.zeros((1, HIDDEN), jnp.float32)
    w1 = (jax.random.normal(ks[1], (HIDDEN, INTERMEDIATE), jnp.float32) * 0.02
          ).astype(jnp.bfloat16)
    w2 = (jax.random.normal(ks[2], (INTERMEDIATE, HIDDEN), jnp.float32) * 0.02
          ).astype(jnp.bfloat16)
    # nn.init.normal_(self.v_head.weight, mean=0.0, std=0.01); shape (1, H)
    v_head = (jax.random.normal(ks[3], (1, HIDDEN), jnp.float32) * 0.01
              ).astype(jnp.bfloat16)
    return dict(embed=embed, gamma=gamma, beta=beta, w1=w1, w2=w2, v_head=v_head)


# ------------------------------- forward glue ------------------------------ #

def reward_model_forward(params, input_ids, attention_mask):
    """Mirrors RewardModel.forward; returns (reward_scores (B,), aux_loss)."""
    B, S = input_ids.shape
    BS = B * S
    if attention_mask is None:
        # PyTorch None path: index S-1 for every row.
        last_idx = jnp.full((B,), S - 1, jnp.int32)
    else:
        # sequence_lengths = mask.sum(1); last = lengths - 1. Clamp >= 0 so an
        # all-zero mask row cannot trigger an unchecked OOB gather on TPU.
        # (Assumes a contiguous left-aligned mask, same as the PyTorch code.)
        last_idx = jnp.maximum(
            attention_mask.astype(jnp.int32).sum(axis=1) - 1, 0)

    ids_col = input_ids.astype(jnp.int32).reshape(BS, 1)
    # Flat last-token index per lane-padded batch row; -1 never matches.
    tgt = jnp.full((LANES,), -1, jnp.int32)
    tgt = tgt.at[:B].set(jnp.arange(B, dtype=jnp.int32) * S + last_idx)
    tgt_col = tgt.reshape(LANES, 1)

    flops = (2 * BS * (VOCAB * HIDDEN + HIDDEN * INTERMEDIATE
                       + INTERMEDIATE * HIDDEN)
             + 2 * LANES * BS * HIDDEN + 2 * LANES * HIDDEN)
    bytes_accessed = (ids_col.size * 4 + tgt_col.size * 4
                      + params["embed"].size * 2 + params["w1"].size * 2
                      + params["w2"].size * 2 + params["v_head"].size * 2
                      + params["gamma"].size * 4 + params["beta"].size * 4
                      + LANES * 4)
    cost = pl.CostEstimate(flops=flops,
                           transcendentals=BS * INTERMEDIATE + BS,
                           bytes_accessed=bytes_accessed)

    scores_row = pl.pallas_call(
        _reward_fwd_kernel,
        out_shape=jax.ShapeDtypeStruct((1, LANES), jnp.float32),
        in_specs=[_VMEM_SPEC] * 8,
        out_specs=_VMEM_SPEC,
        cost_estimate=cost,
        compiler_params=pltpu.CompilerParams(vmem_limit_bytes=32 * 1024 * 1024),
    )(ids_col, tgt_col, params["embed"], params["gamma"], params["beta"],
      params["w1"], params["w2"], params["v_head"])

    reward_scores = scores_row[0, :B]                 # (B,)  == .squeeze(-1)
    aux_loss = jnp.zeros((), jnp.float32)             # TODO(synk): BaseModel aux
    return reward_scores, aux_loss


# ----------------------------- pure-JAX reference --------------------------- #
# Mirrors the kernel's mixed-precision policy (bf16 weights + MXU inputs, f32
# accumulation, f32 LN/gelu) but uses plain index gathers.

def _reference_forward(params, input_ids, attention_mask):
    B, S = input_ids.shape
    bf16 = jnp.bfloat16
    x = params["embed"][input_ids.reshape(-1)].astype(jnp.float32)   # (B*S, H)
    mu = jnp.mean(x, axis=-1, keepdims=True)
    var = jnp.mean((x - mu) ** 2, axis=-1, keepdims=True)
    xn = (x - mu) * lax.rsqrt(var + 1e-5) * params["gamma"] + params["beta"]
    h1 = jax.nn.gelu(jnp.dot(xn.astype(bf16), params["w1"],
                             preferred_element_type=jnp.float32))
    h = x + jnp.dot(h1.astype(bf16), params["w2"],
                    preferred_element_type=jnp.float32)
    h = h.reshape(B, S, HIDDEN)
    if attention_mask is None:
        idx = jnp.full((B,), S - 1, jnp.int32)
    else:
        idx = jnp.maximum(attention_mask.sum(axis=1).astype(jnp.int32) - 1, 0)
    last = h[jnp.arange(B), idx].astype(bf16)                        # (B, H)
    scores = jnp.dot(last, params["v_head"][0],
                     preferred_element_type=jnp.float32)             # (B,)
    return scores, jnp.zeros((), jnp.float32)


# ----------------------------------- main ----------------------------------- #

if __name__ == "__main__":
    key = jax.random.PRNGKey(0)
    pkey, dkey = jax.random.split(key)
    params = init_params(pkey)

    input_ids = jax.random.randint(dkey, (BATCH, SEQ), 0, VOCAB, dtype=jnp.int32)
    # Ragged valid lengths [8, 5] to exercise the last-token gather.
    lengths = jnp.array([SEQ, 5], dtype=jnp.int32)
    attention_mask = (jnp.arange(SEQ)[None, :] < lengths[:, None]).astype(jnp.int32)

    scores, aux_loss = reward_model_forward(params, input_ids, attention_mask)
    scores = jax.block_until_ready(scores)
    aux_loss = jax.block_until_ready(aux_loss)

    ref_scores, ref_aux = _reference_forward(params, input_ids, attention_mask)
    assert scores.shape == (BATCH,)
    assert jnp.allclose(scores, ref_scores, atol=1e-4, rtol=1e-3), (scores, ref_scores)
    assert jnp.allclose(aux_loss, ref_aux)

    # Also exercise the attention_mask=None path.
    scores_none, _ = reward_model_forward(params, input_ids, None)
    scores_none = jax.block_until_ready(scores_none)
    ref_none, _ = _reference_forward(params, input_ids, None)
    assert jnp.allclose(scores_none, ref_none, atol=1e-4, rtol=1e-3), (scores_none, ref_none)

    print("KERNEL_OK")
</pallas_src>

<mosaic_0001>
module attributes {stable_mosaic.version = 11 : i64} {
  func.func @_reward_fwd_kernel(%arg0: memref<16x1xi32, #tpu.memory_space<vmem>>, %arg1: memref<128x1xi32, #tpu.memory_space<vmem>>, %arg2: memref<64x32xbf16, #tpu.memory_space<vmem>>, %arg3: memref<1x32xf32, #tpu.memory_space<vmem>>, %arg4: memref<1x32xf32, #tpu.memory_space<vmem>>, %arg5: memref<32x128xbf16, #tpu.memory_space<vmem>>, %arg6: memref<128x32xbf16, #tpu.memory_space<vmem>>, %arg7: memref<1x32xbf16, #tpu.memory_space<vmem>>, %arg8: memref<1x128xf32, #tpu.memory_space<vmem>>) attributes {dimension_semantics = [], scalar_prefetch = 0 : i64, scratch_operands = 0 : i64, tpu.core_type = #tpu.core_type<tc>} {
    %c0 = arith.constant 0 : index
    %c0_0 = arith.constant 0 : index
    %0 = vector.load %arg0[%c0, %c0_0] : memref<16x1xi32, #tpu.memory_space<vmem>>, vector<16x1xi32>
    %1 = tpu.iota {dimensions = array<i32: 1>} : vector<16x64xi32>
    %2 = vector.broadcast %0 : vector<16x1xi32> to vector<16x64xi32>
    %3 = arith.cmpi eq, %1, %2 : vector<16x64xi32>
    %cst = arith.constant 1.000000e+00 : f32
    %cst_1 = arith.constant 0.000000e+00 : f32
    %4 = vector.broadcast %cst : f32 to vector<16x64xf32>
    %5 = vector.broadcast %cst_1 : f32 to vector<16x64xf32>
    %6 = arith.select %3, %4, %5 : vector<16x64xi1>, vector<16x64xf32>
    %7 = arith.truncf %6 : vector<16x64xf32> to vector<16x64xbf16>
    %c0_2 = arith.constant 0 : index
    %c0_3 = arith.constant 0 : index
    %8 = vector.load %arg2[%c0_2, %c0_3] : memref<64x32xbf16, #tpu.memory_space<vmem>>, vector<64x32xbf16>
    %cst_4 = arith.constant dense<0.000000e+00> : vector<16x32xf32>
    %9 = tpu.matmul %7, %8, %cst_4 {dimension_numbers = #tpu.dot_dimension_numbers<[1], [0], [0], [1], [0, 0, 1, 1], [], []>} : vector<16x64xbf16>, vector<64x32xbf16>, vector<16x32xf32> -> vector<16x32xf32>
    %cst_5 = arith.constant dense<0.000000e+00> : vector<16xf32>
    %10 = vector.multi_reduction <add>, %9, %cst_5 [1] : vector<16x32xf32> to vector<16xf32>
    %11 = vector.shape_cast %10 : vector<16xf32> to vector<16x1xf32>
    %cst_6 = arith.constant 3.200000e+01 : f32
    %12 = vector.broadcast %cst_6 : f32 to vector<16x1xf32>
    %13 = arith.divf %11, %12 : vector<16x1xf32>
    %14 = vector.broadcast %13 : vector<16x1xf32> to vector<16x32xf32>
    %15 = arith.subf %9, %14 : vector<16x32xf32>
    %16 = arith.mulf %15, %15 : vector<16x32xf32>
    %cst_7 = arith.constant dense<0.000000e+00> : vector<16xf32>
    %17 = vector.multi_reduction <add>, %16, %cst_7 [1] : vector<16x32xf32> to vector<16xf32>
    %18 = vector.shape_cast %17 : vector<16xf32> to vector<16x1xf32>
    %cst_8 = arith.constant 3.200000e+01 : f32
    %19 = vector.broadcast %cst_8 : f32 to vector<16x1xf32>
    %20 = arith.divf %18, %19 : vector<16x1xf32>
    %21 = vector.broadcast %13 : vector<16x1xf32> to vector<16x32xf32>
    %22 = arith.subf %9, %21 : vector<16x32xf32>
    %cst_9 = arith.constant 9.99999974E-6 : f32
    %23 = vector.broadcast %cst_9 : f32 to vector<16x1xf32>
    %24 = arith.addf %20, %23 : vector<16x1xf32>
    %25 = math.rsqrt %24 : vector<16x1xf32>
    %26 = vector.broadcast %25 : vector<16x1xf32> to vector<16x32xf32>
    %27 = arith.mulf %22, %26 : vector<16x32xf32>
    %c0_10 = arith.constant 0 : index
    %c0_11 = arith.constant 0 : index
    %28 = vector.load %arg3[%c0_10, %c0_11] : memref<1x32xf32, #tpu.memory_space<vmem>>, vector<1x32xf32>
    %29 = vector.broadcast %28 : vector<1x32xf32> to vector<16x32xf32>
    %30 = arith.mulf %27, %29 : vector<16x32xf32>
    %c0_12 = arith.constant 0 : index
    %c0_13 = arith.constant 0 : index
    %31 = vector.load %arg4[%c0_12, %c0_13] : memref<1x32xf32, #tpu.memory_space<vmem>>, vector<1x32xf32>
    %32 = vector.broadcast %31 : vector<1x32xf32> to vector<16x32xf32>
    %33 = arith.addf %30, %32 : vector<16x32xf32>
    %34 = arith.truncf %33 : vector<16x32xf32> to vector<16x32xbf16>
    %c0_14 = arith.constant 0 : index
    %c0_15 = arith.constant 0 : index
    %35 = vector.load %arg5[%c0_14, %c0_15] : memref<32x128xbf16, #tpu.memory_space<vmem>>, vector<32x128xbf16>
    %cst_16 = arith.constant dense<0.000000e+00> : vector<16x128xf32>
    %36 = tpu.matmul %34, %35, %cst_16 {dimension_numbers = #tpu.dot_dimension_numbers<[1], [0], [0], [1], [0, 0, 1, 1], [], []>} : vector<16x32xbf16>, vector<32x128xbf16>, vector<16x128xf32> -> vector<16x128xf32>
    %37 = arith.mulf %36, %36 : vector<16x128xf32>
    %38 = arith.mulf %36, %37 : vector<16x128xf32>
    %cst_17 = arith.constant 4.471500e-02 : f32
    %39 = vector.broadcast %cst_17 : f32 to vector<16x128xf32>
    %40 = arith.mulf %39, %38 : vector<16x128xf32>
    %41 = arith.addf %36, %40 : vector<16x128xf32>
    %cst_18 = arith.constant 0.797884583 : f32
    %42 = vector.broadcast %cst_18 : f32 to vector<16x128xf32>
    %43 = arith.mulf %42, %41 : vector<16x128xf32>
    %44 = math.tanh %43 : vector<16x128xf32>
    %cst_19 = arith.constant 1.000000e+00 : f32
    %45 = vector.broadcast %cst_19 : f32 to vector<16x128xf32>
    %46 = arith.addf %45, %44 : vector<16x128xf32>
    %cst_20 = arith.constant 5.000000e-01 : f32
    %47 = vector.broadcast %cst_20 : f32 to vector<16x128xf32>
    %48 = arith.mulf %47, %46 : vector<16x128xf32>
    %49 = arith.mulf %36, %48 : vector<16x128xf32>
    %50 = arith.truncf %49 : vector<16x128xf32> to vector<16x128xbf16>
    %c0_21 = arith.constant 0 : index
    %c0_22 = arith.constant 0 : index
    %51 = vector.load %arg6[%c0_21, %c0_22] : memref<128x32xbf16, #tpu.memory_space<vmem>>, vector<128x32xbf16>
    %cst_23 = arith.constant dense<0.000000e+00> : vector<16x32xf32>
    %52 = tpu.matmul %50, %51, %cst_23 {dimension_numbers = #tpu.dot_dimension_numbers<[1], [0], [0], [1], [0, 0, 1, 1], [], []>} : vector<16x128xbf16>, vector<128x32xbf16>, vector<16x32xf32> -> vector<16x32xf32>
    %53 = arith.addf %9, %52 : vector<16x32xf32>
    %54 = tpu.iota {dimensions = array<i32: 1>} : vector<128x16xi32>
    %c0_24 = arith.constant 0 : index
    %c0_25 = arith.constant 0 : index
    %55 = vector.load %arg1[%c0_24, %c0_25] : memref<128x1xi32, #tpu.memory_space<vmem>>, vector<128x1xi32>
    %56 = vector.broadcast %55 : vector<128x1xi32> to vector<128x16xi32>
    %57 = arith.cmpi eq, %54, %56 : vector<128x16xi32>
    %cst_26 = arith.constant 1.000000e+00 : f32
    %cst_27 = arith.constant 0.000000e+00 : f32
    %58 = vector.broadcast %cst_26 : f32 to vector<128x16xf32>
    %59 = vector.broadcast %cst_27 : f32 to vector<128x16xf32>
    %60 = arith.select %57, %58, %59 : vector<128x16xi1>, vector<128x16xf32>
    %61 = arith.truncf %60 : vector<128x16xf32> to vector<128x16xbf16>
    %62 = arith.truncf %53 : vector<16x32xf32> to vector<16x32xbf16>
    %cst_28 = arith.constant dense<0.000000e+00> : vector<128x32xf32>
    %63 = tpu.matmul %61, %62, %cst_28 {dimension_numbers = #tpu.dot_dimension_numbers<[1], [0], [0], [1], [0, 0, 1, 1], [], []>} : vector<128x16xbf16>, vector<16x32xbf16>, vector<128x32xf32> -> vector<128x32xf32>
    %c0_29 = arith.constant 0 : index
    %c0_30 = arith.constant 0 : index
    %64 = vector.load %arg7[%c0_29, %c0_30] : memref<1x32xbf16, #tpu.memory_space<vmem>>, vector<1x32xbf16>
    %65 = arith.truncf %63 : vector<128x32xf32> to vector<128x32xbf16>
    %cst_31 = arith.constant dense<0.000000e+00> : vector<1x128xf32>
    %66 = tpu.matmul %64, %65, %cst_31 {dimension_numbers = #tpu.dot_dimension_numbers<[1], [1], [0], [0], [0, 0, 1, 0], [], []>} : vector<1x32xbf16>, vector<128x32xbf16>, vector<1x128xf32> -> vector<1x128xf32>
    %c0_32 = arith.constant 0 : index
    %c0_33 = arith.constant 0 : index
    %67 = vector.load %arg8[%c0_32, %c0_33] : memref<1x128xf32, #tpu.memory_space<vmem>>, vector<1x128xf32>
    tpu.vector_store %arg8[%c0_32, %c0_33], %66 {strides = array<i32>} : memref<1x128xf32, #tpu.memory_space<vmem>>, vector<1x128xf32>,
    return
  }
}

</mosaic_0001>

<bundles_post_ra>
// kernel: tpu_custom_call.1
= control target key start
LH: loop header
LB: loop body
LE: loop exit
PB: predicated region body
PF: predicated region fallthrough
CT: control target
= control target key end

     0   :  { %v864_v1 = vmov 0   ;;  %v865_v2 = vmov 0.0   ;;  %vm866_vm0 = vmmov 0   ;;  %s1121_s0 = inlined_call_operand.vmem [shape: s32[16,1], index: 0, kind: input, shape index: {}]   ;;  %s1122_s1 = inlined_call_operand.vmem [shape: s32[128,1], index: 1, kind: input, shape index: {}]   ;;  %s1123_s2 = inlined_call_operand.vmem [shape: bf16[64,32], index: 2, kind: input, shape index: {}]   ;;  %s1124_s3 = inlined_call_operand.vmem [shape: f32[1,32], index: 3, kind: input, shape index: {}]   ;;  %s1125_s4 = inlined_call_operand.vmem [shape: f32[1,32], index: 4, kind: input, shape index: {}]   ;;  %s1126_s5 = inlined_call_operand.vmem [shape: bf16[32,128], index: 5, kind: input, shape index: {}]   ;;  %s1127_s6 = inlined_call_operand.vmem [shape: bf16[128,32], index: 6, kind: input, shape index: {}]   ;;  %s1128_s7 = inlined_call_operand.vmem [shape: bf16[1,32], index: 7, kind: input, shape index: {}]   ;;  %s1129_s8 = inlined_call_operand.hbm [shape: f32[1,128], index: 8, kind: output, shape index: {}]  }
   0x1   :  { %v31_v0 = vld [vmem:[%s1121_s0] sm:$0xff]  ;;  %818 = vset.pattern.permute.xlu0 %v864_v1  ;;  %736 = vmatprep.subr.bf16.mxu1 %v865_v2  ;;  %v820_v3 = vld [vmem:[%s1123_s2 + $0x18] sm:$0xff]   ;;  %v32_v4 = vld [vmem:[%s1121_s0 + $0x8] sm:$0xff] }
   0x2   :  { %36 = vperm.xlu0 %818, %v31_v0   ;;  %819 = vset.pattern.permute.xlu1 %v864_v1  ;;  %v821_v5 = vld [vmem:[%s1123_s2 + $0x10] sm:$0xff]   ;;  %v822_v6 = vld [vmem:[%s1123_s2 + $0x8] sm:$0xff]   ;;  %v823_v7 = vld [vmem:[%s1123_s2] sm:$0xff]  }
   0x3   :  { %737 = vmatpush3.bf16.msra.mxu1 %v820_v3  ;;  %744 = vmatprep.mubr.msk.bf16.mxu1 %vm866_vm0, %v865_v2 }
   0x4   :  { %738 = vmatprep.subr.bf16.mxu1 %v865_v2 }
   0x6   :  { %39 = vperm.xlu0 %818, %v32_v4  }
   0x7   :  { %739 = vmatpush3.bf16.msra.mxu1 %v821_v5 }
   0x8   :  { %740 = vmatprep.subr.bf16.mxu1 %v865_v2 }
   0xb   :  { %741 = vmatpush3.bf16.msra.mxu1 %v822_v6 }
   0xc   :  { %13 = vsyncpa [#allocation3], 0  ;;  %742 = vmatprep.subr.bf16.mxu1 %v865_v2  ;;  %v33_v8 = vlaneseq  ;;  %vm78_vm3 = vcmask 523264   ;;  %vm123_vm4 = vcmask 261120   ;;  %v356_v31 = vld [vmem:[%s1122_s1] sm:$0xff]  ;;  %v357_v33 = vld [vmem:[%s1122_s1 + $0x8] sm:$0xff] }
   0xd   :  { %v360_v32 = vld [vmem:[%s1122_s1 + $0x20] sm:$0xff]  ;;  %v366_v34 = vld [vmem:[%s1122_s1 + $0x50] sm:$0xff]  ;;  %v359_v37 = vld [vmem:[%s1122_s1 + $0x18] sm:$0xff]  ;;  %vm461_vm7 = vcmask 130048   ;;  %s867_s19 = smov [#allocation2]  }
   0xe   :  { %v938_v9 = vand.u32 127, %v33_v8  ;;  %v358_v35 = vld [vmem:[%s1122_s1 + $0x10] sm:$0xff]  ;;  %v368_v36 = vld [vmem:[%s1122_s1 + $0x60] sm:$0xff]  ;;  %v824_v39 = vld [vmem:[%s1126_s5 + $0x8] sm:$0xff]   ;;  %s666_s20 = sshll.u32 %s867_s19, 4  ;;  %s667_s20 = int_to_ptr.vmem [resolvable:$true] %s666_s20 }
   0xf   :  { %743 = vmatpush3.bf16.msra.mxu1 %v823_v7  ;;  %v370_v38 = vld [vmem:[%s1122_s1 + $0x70] sm:$0xff]  ;;  %v361_v40 = vld [vmem:[%s1122_s1 + $0x28] sm:$0xff]  ;;  %v825_v41 = vld [vmem:[%s1126_s5] sm:$0xff]   ;;  %s842_s21 = scalar_lea.vmem %s667_s20, 16  ;;  %s846_s22 = scalar_lea.vmem %s667_s20, 32 }
  0x10   :  { %748 = vmatprep.subr.bf16.mxu1 %v865_v2  ;;  %v362_v42 = vld [vmem:[%s1122_s1 + $0x30] sm:$0xff]  ;;  %v363_v43 = vld [vmem:[%s1122_s1 + $0x38] sm:$0xff]  ;;  %v364_v44 = vld [vmem:[%s1122_s1 + $0x40] sm:$0xff]  ;;  %p843_p0 = scmp.ne.s32.totalorder %s667_s20, %s842_s21  ;;  %p847_p1 = scmp.lt.s32.totalorder %s667_s20, %s667_s20 }
  0x11   :  { %v365_v45 = vld [vmem:[%s1122_s1 + $0x48] sm:$0xff]  ;;  %v367_v46 = vld [vmem:[%s1122_s1 + $0x58] sm:$0xff]  ;;  %v679_v57 = vld [vmem:[%s1124_s3] ss:$0 sm:$0xff]  ;;  %p848_p2 = scmp.lt.s32.totalorder %s846_s22, %s842_s21 }
  0x12   :  { %v369_v47 = vld [vmem:[%s1122_s1 + $0x68] sm:$0xff]  ;;  %v371_v48 = vld [vmem:[%s1122_s1 + $0x78] sm:$0xff]  ;;  %v680_v61 = vld [vmem:[%s1125_s4] ss:$0 sm:$0xff] }
  0x13   :  { %v826_v3 = vld [vmem:[%s1127_s6 + $0x38] sm:$0xff]   ;;  %v827_v4 = vld [vmem:[%s1127_s6 + $0x30] sm:$0xff]   ;;  %v828_v5 = vld [vmem:[%s1127_s6 + $0x28] sm:$0xff]   ;;  %p849_p3 = por %p848_p2, %p847_p1 }
  0x14   :  { %v829_v6 = vld [vmem:[%s1127_s6 + $0x20] sm:$0xff]   ;;  %v830_v7 = vld [vmem:[%s1127_s6 + $0x18] sm:$0xff]  }
  0x15   :  { %p850_p4 = pnand %p849_p3, %p843_p0 }
  0x7d   :  { %v37_v10 = vpop.permute.xlu0 %36 }
  0x7e   :  { %vm41_vm1 = vcmp.eq.s32.totalorder %v938_v9, %v37_v10  ;;  %v831_v10 = vld [vmem:[%s1127_s6 + $0x10] sm:$0xff]  }
  0x7f   :  { %v43_v12 = vsel %vm41_vm1, 1.0, %v865_v2 }
  0x81   :  { %v40_v11 = vpop.permute.xlu0 %39 }
  0x82   :  { %vm42_vm2 = vcmp.eq.s32.totalorder %v938_v9, %v40_v11  ;;  %v832_v11 = vld [vmem:[%s1127_s6 + $0x8] sm:$0xff]  }
  0x83   :  { %v44_v13 = vsel %vm42_vm2, 1.0, %v865_v2 }
  0x84   :  { %v45_v14 = vpack.c.bf16 %v44_v13, %v43_v12  ;;  %v833_v13 = vld [vmem:[%s1127_s6] sm:$0xff]  }
  0x86   :  { %745 = vmatmul.mubr.msk.bf16.vlgmr.msra.gmra.mxu1 %vm78_vm3, %v45_v14 }
  0x87   :  { %752 = vmatprep.mubr.msk.bf16.mxu1 %vm866_vm0, %v865_v2  ;;  %749 = vmatpush3.bf16.msra.mxu1 %v824_v39 }
  0x88   :  { %750 = vmatprep.subr.bf16.mxu1 %v865_v2 }
  0x8b   :  { %751 = vmatpush3.bf16.msra.mxu1 %v825_v41 }
  0x8c   :  { %756 = vmatprep.subr.bf16.mxu1 %v865_v2 }
 0x146   :  { %v946_v15 = vpop.f32.mrf.mxu1 }
 0x147   :  { %v124_v16 = vsel %vm123_vm4, %v946_v15, 0.0 }
 0x148   :  { %125 = vadd.xlane.f32.xlu1 %v124_v16  ;;  %v746_v17 = vpop.f32.mrf.mxu1 }
 0x14a   :  { %v950_v18 = vpop.f32.mrf.mxu1 }
 0x14b   :  { %v127_v19 = vsel %vm123_vm4, %v950_v18, 0.0 }
 0x14c   :  { %128 = vadd.xlane.f32.xlu1 %v127_v19  ;;  %v747_v20 = vpop.f32.mrf.mxu1 }
 0x1d1   :  { %v126_v21 = vpop.xlane.xlu1 %125 }
 0x1d2   :  { %v131_v22 = vmul.f32 0.03125, %v126_v21 }
 0x1d4   :  { %v133_v23 = vsub.f32 %v946_v15, %v131_v22 }
 0x1d5   :  { %v129_v24 = vpop.xlane.xlu1 %128 }
 0x1d6   :  { %v132_v25 = vmul.f32 0.03125, %v129_v24  ;;  %v135_v26 = vmul.f32 %v133_v23, %v133_v23 }
 0x1d8   :  { %v134_v27 = vsub.f32 %v950_v18, %v132_v25  ;;  %v137_v28 = vsel %vm123_vm4, %v135_v26, 0.0 }
 0x1d9   :  { %138 = vadd.xlane.f32.xlu0 %v137_v28 }
 0x1da   :  { %v136_v29 = vmul.f32 %v134_v27, %v134_v27 }
 0x1dc   :  { %v140_v30 = vsel %vm123_vm4, %v136_v29, 0.0 }
 0x1dd   :  { %141 = vadd.xlane.f32.xlu1 %v140_v30 }
 0x1ee   :  { %373 = vperm.xlu1 %819, %v356_v31  }
 0x1ef   :  { %385 = vperm.xlu0 %818, %v360_v32  }
 0x1f2   :  { %376 = vperm.xlu1 %819, %v357_v33  }
 0x1f3   :  { %403 = vperm.xlu0 %818, %v366_v34  }
 0x1f6   :  { %379 = vperm.xlu1 %819, %v358_v35  }
 0x1f7   :  { %409 = vperm.xlu0 %818, %v368_v36  }
 0x1fa   :  { %382 = vperm.xlu1 %819, %v359_v37  }
 0x1fb   :  { %415 = vperm.xlu0 %818, %v370_v38  }
 0x1fe   :  { %388 = vperm.xlu1 %819, %v361_v40  }
 0x202   :  { %391 = vperm.xlu1 %819, %v362_v42  }
 0x206   :  { %394 = vperm.xlu1 %819, %v363_v43  }
 0x20a   :  { %397 = vperm.xlu1 %819, %v364_v44  }
 0x20e   :  { %400 = vperm.xlu1 %819, %v365_v45  }
 0x212   :  { %406 = vperm.xlu1 %819, %v367_v46  }
 0x216   :  { %412 = vperm.xlu1 %819, %v369_v47  }
 0x21a   :  { %418 = vperm.xlu1 %819, %v371_v48  }
 0x262   :  { %v139_v49 = vpop.xlane.xlu0 %138 }
 0x263   :  { %v143_v50 = vmul.f32 0.03125, %v139_v49 }
 0x265   :  { %v145_v51 = vadd.f32 1e-05, %v143_v50 }
 0x266   :  { %v142_v52 = vpop.xlane.xlu1 %141 }
 0x267   :  { %834 = vrsqrt.f32 %v145_v51  ;;  %v144_v53 = vmul.f32 0.03125, %v142_v52 }
 0x269   :  { %v146_v54 = vadd.f32 1e-05, %v144_v53 }
 0x26a   :  { %v374_v8 = vpop.permute.xlu1 %373  ;;  %v386_v51 = vpop.permute.xlu0 %385 }
 0x26b   :  { %836 = vrsqrt.f32 %v146_v54  ;;  %vm420_vm5 = vcmp.eq.s32.totalorder %v938_v9, %v374_v8  ;;  %vm424_vm11 = vcmp.eq.s32.totalorder %v938_v9, %v386_v51 }
 0x26c   :  { %v436_v14 = vsel %vm420_vm5, 1.0, %v865_v2 }
 0x26e   :  { %v377_v12 = vpop.permute.xlu1 %376 }
 0x26f   :  { %vm421_vm6 = vcmp.eq.s32.totalorder %v938_v9, %v377_v12 }
 0x270   :  { %v437_v16 = vsel %vm421_vm6, 1.0, %v865_v2 }
 0x271   :  { %v452_v17 = vpack.c.bf16 %v437_v16, %v436_v14 }
 0x272   :  { %v380_v42 = vpop.permute.xlu1 %379 }
 0x273   :  { %778 = vmatprep.mubr.msk.bf16.mxu0 %vm461_vm7, %v452_v17  ;;  %vm422_vm8 = vcmp.eq.s32.totalorder %v938_v9, %v380_v42 }
 0x274   :  { %v835_v55 = vpop.eup %834 }
 0x275   :  { %v149_v56 = vmul.f32 %v835_v55, %v133_v23 }
 0x276   :  { %v383_v43 = vpop.permute.xlu1 %382 }
 0x277   :  { %v158_v60 = vmul.f32 %v679_v57, %v149_v56  ;;  %vm423_vm9 = vcmp.eq.s32.totalorder %v938_v9, %v383_v43 }
 0x278   :  { %v837_v58 = vpop.eup %836 }
 0x279   :  { %v150_v59 = vmul.f32 %v837_v58, %v134_v27  ;;  %v167_v63 = vadd.f32 %v680_v61, %v158_v60  ;;  %v439_v58 = vsel %vm423_vm9, 1.0, %v865_v2  ;;  %v440_v60 = vsel %vm424_vm11, 1.0, %v865_v2 }
 0x27a   :  { %v389_v44 = vpop.permute.xlu1 %388 }
 0x27b   :  { %v159_v62 = vmul.f32 %v679_v57, %v150_v59  ;;  %vm425_vm10 = vcmp.eq.s32.totalorder %v938_v9, %v389_v44  ;;  %v438_v57 = vsel %vm422_vm8, 1.0, %v865_v2 }
 0x27c   :  { %v441_v59 = vsel %vm425_vm10, 1.0, %v865_v2 }
 0x27d   :  { %v168_v0 = vadd.f32 %v680_v61, %v159_v62  ;;  %v404_v62 = vpop.permute.xlu0 %403 }
 0x27e   :  { %v392_v45 = vpop.permute.xlu1 %391  ;;  %vm430_vm3 = vcmp.eq.s32.totalorder %v938_v9, %v404_v62 }
 0x27f   :  { %v169_v1 = vpack.c.bf16 %v168_v0, %v167_v63  ;;  %vm426_vm12 = vcmp.eq.s32.totalorder %v938_v9, %v392_v45 }
 0x280   :  { %v442_v63 = vsel %vm426_vm12, 1.0, %v865_v2 }
 0x281   :  { %753 = vmatmul.mubr.msk.bf16.vlgmr.msra.gmra.mxu1 %vm123_vm4, %v169_v1 }
 0x282   :  { %772 = vmatprep.mubr.msk.bf16.mxu1 %vm866_vm0, %v865_v2  ;;  %757 = vmatpush3.bf16.msra.mxu1 %v826_v3  ;;  %v395_v46 = vpop.permute.xlu1 %394 }
 0x283   :  { %758 = vmatprep.subr.bf16.mxu1 %v865_v2  ;;  %vm427_vm13 = vcmp.eq.s32.totalorder %v938_v9, %v395_v46 }
 0x284   :  { %v443_v0 = vsel %vm427_vm13, 1.0, %v865_v2 }
 0x286   :  { %759 = vmatpush3.bf16.msra.mxu1 %v827_v4  ;;  %v398_v48 = vpop.permute.xlu1 %397  ;;  %v455_v4 = vpack.c.bf16 %v443_v0, %v442_v63 }
 0x287   :  { %760 = vmatprep.subr.bf16.mxu1 %v865_v2  ;;  %vm428_vm14 = vcmp.eq.s32.totalorder %v938_v9, %v398_v48 }
 0x288   :  { %v444_v1 = vsel %vm428_vm14, 1.0, %v865_v2 }
 0x28a   :  { %761 = vmatpush3.bf16.msra.mxu1 %v828_v5  ;;  %v401_v55 = vpop.permute.xlu1 %400 }
 0x28b   :  { %762 = vmatprep.subr.bf16.mxu1 %v865_v2  ;;  %vm429_vm15 = vcmp.eq.s32.totalorder %v938_v9, %v401_v55 }
 0x28c   :  { %v445_v3 = vsel %vm429_vm15, 1.0, %v865_v2 }
 0x28e   :  { %763 = vmatpush3.bf16.msra.mxu1 %v829_v6  ;;  %v407_v61 = vpop.permute.xlu1 %406  ;;  %v456_v6 = vpack.c.bf16 %v445_v3, %v444_v1 }
 0x28f   :  { %764 = vmatprep.subr.bf16.mxu1 %v865_v2  ;;  %vm431_vm1 = vcmp.eq.s32.totalorder %v938_v9, %v407_v61 }
 0x290   :  { %v447_v8 = vsel %vm431_vm1, 1.0, %v865_v2 }
 0x292   :  { %765 = vmatpush3.bf16.msra.mxu1 %v830_v7  ;;  %v413_v5 = vpop.permute.xlu1 %412  ;;  %v410_v7 = vpop.permute.xlu0 %409 }
 0x293   :  { %766 = vmatprep.subr.bf16.mxu1 %v865_v2  ;;  %vm433_vm2 = vcmp.eq.s32.totalorder %v938_v9, %v413_v5  ;;  %vm432_vm5 = vcmp.eq.s32.totalorder %v938_v9, %v410_v7 }
 0x296   :  { %767 = vmatpush3.bf16.msra.mxu1 %v831_v10  ;;  %v449_v10 = vsel %vm433_vm2, 1.0, %v865_v2  ;;  %v419_v12 = vpop.permute.xlu1 %418  ;;  %v416_v16 = vpop.permute.xlu0 %415 }
 0x297   :  { %768 = vmatprep.subr.bf16.mxu1 %v865_v2  ;;  %vm435_vm6 = vcmp.eq.s32.totalorder %v938_v9, %v419_v12  ;;  %vm434_vm8 = vcmp.eq.s32.totalorder %v938_v9, %v416_v16 }
 0x29a   :  { %769 = vmatpush3.bf16.msra.mxu1 %v832_v11  ;;  %v446_v11 = vsel %vm430_vm3, 1.0, %v865_v2 }
 0x29b   :  { %770 = vmatprep.subr.bf16.mxu1 %v865_v2  ;;  %v457_v14 = vpack.c.bf16 %v447_v8, %v446_v11 }
 0x29e   :  { %771 = vmatpush3.bf16.msra.mxu1 %v833_v13  ;;  %v448_v13 = vsel %vm432_vm5, 1.0, %v865_v2 }
 0x29f   :  { %v458_v17 = vpack.c.bf16 %v449_v10, %v448_v13 }
 0x341   :  { %v223_v19 = vpop.f32.mrf.mxu1 }
 0x342   :  { %v230_v20 = vmul.f32 %v223_v19, %v223_v19 }
 0x343   :  { %v754_v21 = vpop.f32.mrf.mxu1 }
 0x344   :  { %v232_v22 = vmul.f32 %v230_v20, %v223_v19  ;;  %v450_v20 = vsel %vm434_vm8, 1.0, %v865_v2 }
 0x345   :  { %v226_v23 = vpop.f32.mrf.mxu1 }
 0x346   :  { %v234_v24 = vmul.f32 0.044715, %v232_v22  ;;  %v231_v25 = vmul.f32 %v226_v23, %v226_v23 }
 0x347   :  { %v755_v26 = vpop.f32.mrf.mxu1 }
 0x348   :  { %v236_v27 = vadd.f32 %v234_v24, %v223_v19  ;;  %v233_v28 = vmul.f32 %v231_v25, %v226_v23 }
 0x34a   :  { %v238_v29 = vmul.f32 0.7978846, %v236_v27  ;;  %v235_v30 = vmul.f32 0.044715, %v233_v28 }
 0x34c   :  { %838 = vtanh.f32 %v238_v29  ;;  %v237_v31 = vadd.f32 %v235_v30, %v226_v23 }
 0x34e   :  { %v239_v32 = vmul.f32 0.7978846, %v237_v31 }
 0x350   :  { %840 = vtanh.f32 %v239_v32 }
 0x359   :  { %v839_v33 = vpop.eup %838 }
 0x35a   :  { %v242_v34 = vadd.f32 1.0, %v839_v33 }
 0x35c   :  { %v244_v36 = vmul.f32 0.5, %v242_v34 }
 0x35d   :  { %v841_v35 = vpop.eup %840 }
 0x35e   :  { %v243_v37 = vadd.f32 1.0, %v841_v35  ;;  %v246_v39 = vmul.f32 %v244_v36, %v223_v19  ;;  %v451_v19 = vsel %vm435_vm6, 1.0, %v865_v2 }
 0x35f   :  { %v459_v21 = vpack.c.bf16 %v451_v19, %v450_v20 }
 0x360   :  { %v245_v38 = vmul.f32 0.5, %v243_v37 }
 0x362   :  { %v247_v40 = vmul.f32 %v245_v38, %v226_v23 }
 0x364   :  { %v248_v41 = vpack.c.bf16 %v247_v40, %v246_v39 }
 0x366   :  { %773 = vmatmul.mubr.bf16.vlgmr.msra.gmra.mxu1 %v248_v41 }
 0x426   :  { %v347_v47 = vpop.f32.mrf.mxu1 }
 0x427   :  { %v354_v52 = vadd.f32 %v347_v47, %v946_v15  ;;  %v453_v15 = vpack.c.bf16 %v439_v58, %v438_v57 }
 0x428   :  { %v774_v49 = vpop.f32.mrf.mxu1 }
 0x42a   :  { %v350_v50 = vpop.f32.mrf.mxu1 }
 0x42b   :  { %v355_v53 = vadd.f32 %v350_v50, %v950_v18  ;;  %v454_v18 = vpack.c.bf16 %v441_v59, %v440_v60 }
 0x42c   :  { %v775_v54 = vpop.f32.mrf.mxu1 }
 0x42d   :  { %v460_v56 = vpack.c.bf16 %v355_v53, %v354_v52  ;;  %v583_v53 = vld [vmem:[%s1128_s7] sm:$0x1] }
 0x42f   :  { %776 = vmatprep.subr.bf16.mxu0 %v460_v56 }
 0x430   :  { %777 = vmatpush3.bf16.msra.mxu0 %v460_v56 }
 0x431   :  { %794 = vmatprep.subr.bf16.mxu0 %v865_v2 }
 0x433   :  { %779 = vmatmul.mubr.msk.bf16.vlgmr.msra.gmra.mxu0 %vm461_vm7, %v453_v15 }
 0x434   :  { %782 = vmatprep.mubr.msk.bf16.mxu0 %vm461_vm7, %v454_v18 }
 0x43b   :  { %783 = vmatmul.mubr.msk.bf16.gmra.mxu0 %vm461_vm7, %v455_v4 }
 0x43c   :  { %786 = vmatprep.mubr.msk.bf16.mxu0 %vm461_vm7, %v456_v6 }
 0x443   :  { %787 = vmatmul.mubr.msk.bf16.gmra.mxu0 %vm461_vm7, %v457_v14 }
 0x444   :  { %790 = vmatprep.mubr.msk.bf16.mxu0 %vm461_vm7, %v458_v17 }
 0x44b   :  { %791 = vmatmul.mubr.msk.bf16.gmra.mxu0 %vm461_vm7, %v459_v21 }
 0x44c   :  { %810 = vmatprep.mubr.msk.bf16.mxu0 %vm866_vm0, %v865_v2 }
 0x4f3   :  { %v780_v22 = vpop.f32.mrf.mxu0 }
 0x4f5   :  { %v520_v23 = vpop.f32.mrf.mxu0 }
 0x4f7   :  { %v781_v24 = vpop.f32.mrf.mxu0 }
 0x4f8   :  { %v585_v25 = vpack.c.bf16 %v781_v24, %v780_v22 }
 0x4f9   :  { %v523_v26 = vpop.f32.mrf.mxu0 }
 0x4fa   :  { %v584_v27 = vpack.c.bf16 %v523_v26, %v520_v23  ;;  %v599_v51 = vsel %vm123_vm4, %v585_v25, 0 }
 0x4fb   :  { %v784_v28 = vpop.f32.mrf.mxu0 }
 0x4fc   :  { %v596_v52 = vsel %vm123_vm4, %v584_v27, 0 }
 0x4fd   :  { %v536_v29 = vpop.f32.mrf.mxu0 }
 0x4ff   :  { %v785_v30 = vpop.f32.mrf.mxu0 }
 0x500   :  { %v587_v47 = vpack.c.bf16 %v785_v30, %v784_v28 }
 0x501   :  { %v539_v9 = vpop.f32.mrf.mxu0 }
 0x502   :  { %v605_v48 = vsel %vm123_vm4, %v587_v47, 0  ;;  %v586_v49 = vpack.c.bf16 %v539_v9, %v536_v29 }
 0x503   :  { %v788_v31 = vpop.f32.mrf.mxu0 }
 0x504   :  { %v602_v50 = vsel %vm123_vm4, %v586_v49, 0 }
 0x505   :  { %v552_v32 = vpop.f32.mrf.mxu0 }
 0x507   :  { %v789_v33 = vpop.f32.mrf.mxu0 }
 0x508   :  { %v589_v43 = vpack.c.bf16 %v789_v33, %v788_v31 }
 0x509   :  { %v555_v34 = vpop.f32.mrf.mxu0 }
 0x50a   :  { %v611_v44 = vsel %vm123_vm4, %v589_v43, 0  ;;  %v588_v45 = vpack.c.bf16 %v555_v34, %v552_v32 }
 0x50b   :  { %v792_v35 = vpop.f32.mrf.mxu0 }
 0x50c   :  { %v608_v46 = vsel %vm123_vm4, %v588_v45, 0 }
 0x50d   :  { %v568_v36 = vpop.f32.mrf.mxu0 }
 0x50f   :  { %v793_v37 = vpop.f32.mrf.mxu0 }
 0x510   :  { %v591_v38 = vpack.c.bf16 %v793_v37, %v792_v35 }
 0x511   :  { %v571_v40 = vpop.f32.mrf.mxu0 }
 0x512   :  { %v617_v39 = vsel %vm123_vm4, %v591_v38, 0  ;;  %v590_v41 = vpack.c.bf16 %v571_v40, %v568_v36 }
 0x513   :  { %795 = vmatpush3.bf16.xpose.msra.mxu0 %v617_v39 }
 0x514   :  { %796 = vmatprep.subr.bf16.mxu0 %v865_v2  ;;  %v614_v42 = vsel %vm123_vm4, %v590_v41, 0 }
 0x51b   :  { %797 = vmatpush3.bf16.xpose.msra.mxu0 %v614_v42 }
 0x51c   :  { %798 = vmatprep.subr.bf16.mxu0 %v865_v2 }
 0x523   :  { %799 = vmatpush3.bf16.xpose.msra.mxu0 %v611_v44 }
 0x524   :  { %800 = vmatprep.subr.bf16.mxu0 %v865_v2 }
 0x52b   :  { %801 = vmatpush3.bf16.xpose.msra.mxu0 %v608_v46 }
 0x52c   :  { %802 = vmatprep.subr.bf16.mxu0 %v865_v2 }
 0x533   :  { %803 = vmatpush3.bf16.xpose.msra.mxu0 %v605_v48 }
 0x534   :  { %804 = vmatprep.subr.bf16.mxu0 %v865_v2 }
 0x53b   :  { %805 = vmatpush3.bf16.xpose.msra.mxu0 %v602_v50 }
 0x53c   :  { %806 = vmatprep.subr.bf16.mxu0 %v865_v2 }
 0x543   :  { %807 = vmatpush3.bf16.xpose.msra.mxu0 %v599_v51 }
 0x544   :  { %808 = vmatprep.subr.bf16.mxu0 %v865_v2 }
 0x54b   :  { %809 = vmatpush3.bf16.xpose.msra.mxu0 %v596_v52 }
 0x552   :  { %811 = vmatmul.mubr.msk.bf16.vlgmr.msra.gmra.mxu0 %vm123_vm4, %v583_v53 }
 0x612   :  { %v653_v54 = vpop.f32.mrf.mxu0 }
 0x613   :  { %659 = vst [vmem:[#allocation2] sm:$0x1] %v653_v54 }
 0x614   :  { %v812_v55 = vpop.f32.mrf.mxu0 }
 0x615   :  { %853 = shalt.err (!%p850_p4)
}
 0x616   :  { %669 = dma.vmem_to_hbm [thread:$0]  %s667_s20, 16, %s1129_s8, [#allocation3]   ;;  %v656_v2 = vpop.f32.mrf.mxu0 }
 0x618   :  { %v813_v56 = vpop.f32.mrf.mxu0 }
 0x619   :  { %862 = dma.done.wait [#allocation3], 16  }
 0x61a   :  { %863 = vsyncadd [#allocation3], 4294967280 }
 0x61b   :  { %673 = vsyncpa [#allocation3], 1 }

</bundles_post_ra>
